<compile_context>
chip_gen: v7x
topology: tpu7x:2x2x1
jax: 0.10.0
libtpu: 0.0.40
codegen_flags: <defaults>
</compile_context>

<pallas_src>
import math

import jax
import jax.numpy as jnp
import numpy as np
from jax.experimental import pallas as pl
from jax.experimental.pallas import tpu as pltpu


def _round_up(n, m):
    return ((n + m - 1) // m) * m


# ----------------------------------------------------------------------------
# wrapper-side parameter preparation (head-major, scale-folded, zero-padded)
# ----------------------------------------------------------------------------
def _prep_mha_params(params, heads):
    """Build head-major, 128-aligned, bf16 weights for the kernel.

    Returns (w_heads, b_heads, wo_heads, bo, hd, hdp, Ep) with
      w_heads  : (H, Ep, 3*hdp) bf16  per-head [Wq*scale | Wk | Wv], x@W layout
      b_heads  : (H, 1, 3*hdp)  f32   per-head [bq*scale | bk | bv]
      wo_heads : (H, hdp, Ep)   bf16  per-head out_proj rows (zero-padded)
      bo       : (1, Ep)        f32   out_proj bias (zero-padded)
    Zero padding of head_dim -> hdp and channels E -> Ep is exact.
    """
    in_w = jnp.asarray(params["in_proj_weight"], jnp.float32)   # (3E, E)
    in_b = jnp.asarray(params["in_proj_bias"], jnp.float32)     # (3E,)
    ow = jnp.asarray(params["out_proj_weight"], jnp.float32)    # (E, E)
    ob = jnp.asarray(params["out_proj_bias"], jnp.float32)      # (E,)

    E = ow.shape[0]
    H = heads
    hd = E // H
    hdp = _round_up(hd, 128)          # head_dim padded to a lane multiple
    Ep = _round_up(E, 128)            # channel width padded to a lane multiple
    scale = 1.0 / math.sqrt(hd)       # nn.MultiheadAttention q-scaling

    # pre-transpose to y = x @ W (+ b) layout; fold the attention scale into Q
    wq = in_w[0:E].T * scale
    wk = in_w[E:2 * E].T
    wv = in_w[2 * E:3 * E].T
    bq = in_b[0:E] * scale
    bk = in_b[E:2 * E]
    bv = in_b[2 * E:3 * E]

    def head_cols(w):   # (E, E) -> (H, Ep, hdp), head-major columns, zero pad
        w = w.reshape(E, H, hd).transpose(1, 0, 2)               # (H, E, hd)
        return jnp.pad(w, ((0, 0), (0, Ep - E), (0, hdp - hd)))

    def head_bias(b):   # (E,) -> (H, 1, hdp)
        return jnp.pad(b.reshape(H, 1, hd), ((0, 0), (0, 0), (0, hdp - hd)))

    w_heads = jnp.concatenate(
        [head_cols(wq), head_cols(wk), head_cols(wv)], axis=-1
    ).astype(jnp.bfloat16)                                        # (H, Ep, 3*hdp)
    b_heads = jnp.concatenate(
        [head_bias(bq), head_bias(bk), head_bias(bv)], axis=-1)   # (H, 1, 3*hdp) f32

    wo = ow.T.reshape(H, hd, E)        # row index = h*hd + d of the head concat
    wo_heads = jnp.pad(wo, ((0, 0), (0, hdp - hd), (0, Ep - E))).astype(jnp.bfloat16)
    bo = jnp.pad(ob, (0, Ep - E)).reshape(1, Ep)                  # f32

    return w_heads, b_heads, wo_heads, bo, hd, hdp, Ep


# ----------------------------------------------------------------------------
# kernel: one (batch_block, head) grid step
# ----------------------------------------------------------------------------
def _mha_head_kernel(x_ref, wqkv_ref, bqkv_ref, wo_ref, bo_ref, o_ref):
    """Fused per-head self-attention; heads accumulate into the resident output.

    x_ref    : (bb, S, Ep)      bf16 activations (same block across the head axis)
    wqkv_ref : (1, Ep, 3*hdp)   bf16 head-major [Wq*scale | Wk | Wv]
    bqkv_ref : (1, 1, 3*hdp)    f32  [bq*scale | bk | bv] for this head
    wo_ref   : (1, hdp, Ep)     bf16 out_proj rows for this head
    bo_ref   : (1, Ep)          f32  out_proj bias (added once, at h == 0)
    o_ref    : (bb, S, Ep)      f32  output block, resident across the head axis
    """
    h = pl.program_id(1)
    bb, S, Ep = x_ref.shape
    hdp = wqkv_ref.shape[-1] // 3

    # fused QKV projection for this head: ONE bf16 MXU matmul over the batch block
    x2 = x_ref[...].reshape(bb * S, Ep)                       # leading collapse (free)
    qkv = jnp.dot(x2, wqkv_ref[0],
                  preferred_element_type=jnp.float32) + bqkv_ref[0]   # (bb*S, 3*hdp) f32
    qkv = qkv.reshape(bb, S, 3 * hdp)

    # lane-aligned static slices (hdp is a multiple of 128): no gather/stack copies
    q = qkv[:, :, 0 * hdp:1 * hdp].astype(jnp.bfloat16)
    k = qkv[:, :, 1 * hdp:2 * hdp].astype(jnp.bfloat16)
    v = qkv[:, :, 2 * hdp:3 * hdp].astype(jnp.bfloat16)

    # scores + numerically stable softmax statistics (elementwise math in f32)
    # TODO(synk): replace with a flash-style KV-tile loop for production S (v7x VMEM).
    s = jnp.einsum("bqd,bkd->bqk", q, k,
                   preferred_element_type=jnp.float32)        # (bb, S, S) f32
    p = jnp.exp(s - jnp.max(s, axis=-1, keepdims=True))
    l = jnp.sum(p, axis=-1, keepdims=True)                    # (bb, S, 1)

    # PV on unnormalized probabilities (bf16 operands), then normalize the (S, hdp)
    # output instead of the (S, S) matrix.  approx=False: the approximate EUP
    # reciprocal (~1e-2 rel error) previously broke 2e-3 parity with the reference.
    attn = jnp.einsum("bqk,bkd->bqd", p.astype(jnp.bfloat16), v,
                      preferred_element_type=jnp.float32)     # (bb, S, hdp) f32
    attn = attn * pl.reciprocal(l, approx=False)

    # head merge folded into out_proj: each head adds a full-E partial sum
    part = jnp.dot(attn.reshape(bb * S, hdp).astype(jnp.bfloat16), wo_ref[0],
                   preferred_element_type=jnp.float32).reshape(bb, S, Ep)

    @pl.when(h == 0)
    def _():
        o_ref[...] = part + bo_ref[...].reshape(1, 1, Ep)

    @pl.when(h != 0)
    def _():
        o_ref[...] = o_ref[...] + part


# ----------------------------------------------------------------------------
# wrapper: SelfAttentionLayerWave.forward
# ----------------------------------------------------------------------------
def self_attention_layer_wave(x, params, *, heads, batch_block=None):
    """x: (B, C, S) float32 -> (B, C, S); matches SelfAttentionLayerWave.forward."""
    B, E, S = x.shape
    assert E % heads == 0, "in_dim must be divisible by heads"

    w_heads, b_heads, wo_heads, bo, hd, hdp, Ep = _prep_mha_params(params, heads)

    if batch_block is None:
        # One fused batch step: best on single-TensorCore v5e/v6e (largest matmul
        # M-dim, no extra per-step overhead).  On v7x (2 TCs) pass batch_block=B//2
        # so both cores get a "parallel" grid step.
        batch_block = B
    assert B % batch_block == 0, "batch_block must divide the batch size"
    grid = (B // batch_block, heads)

    # glue: (B, C, S) -> (B, S, E), zero-pad channels E -> Ep (lane-dense 128-aligned
    # stores / slices), cast activations to bf16 (halves DMA; bf16-native MXU).
    x_bse = jnp.transpose(x, (0, 2, 1)).astype(jnp.float32)
    x_pad = jnp.pad(x_bse, ((0, 0), (0, 0), (0, Ep - E))).astype(jnp.bfloat16)

    out_pad = pl.pallas_call(
        _mha_head_kernel,
        out_shape=jax.ShapeDtypeStruct((B, S, Ep), jnp.float32),
        grid=grid,
        in_specs=[
            pl.BlockSpec((batch_block, S, Ep), lambda b, h: (b, 0, 0)),  # x (reused over h)
            pl.BlockSpec((1, Ep, 3 * hdp), lambda b, h: (h, 0, 0)),      # per-head Wqkv (bf16)
            pl.BlockSpec((1, 1, 3 * hdp), lambda b, h: (h, 0, 0)),       # per-head bqkv (f32)
            pl.BlockSpec((1, hdp, Ep), lambda b, h: (h, 0, 0)),          # per-head Wo rows (bf16)
            # constant-index bias: (1, Ep) is tiny, so single-buffering it would only
            # save ~Ep*4 bytes of VMEM; left double-buffered for simplicity.
            pl.BlockSpec((1, Ep), lambda b, h: (0, 0)),
        ],
        out_specs=pl.BlockSpec((batch_block, S, Ep), lambda b, h: (b, 0, 0)),
        compiler_params=pltpu.CompilerParams(
            # batch axis shardable across cores; head axis is a reduction into the
            # resident output block.
            dimension_semantics=("parallel", "arbitrary"),
            # v5e/v6e have 128 MiB physical VMEM (could go higher); keep <= ~48 MiB
            # on v7x (64 MiB physical).
            vmem_limit_bytes=64 * 1024 * 1024),
    )(x_pad, w_heads, b_heads, wo_heads, bo)

    # glue: drop channel padding, (B, S, E) -> (B, C, S)
    return jnp.transpose(out_pad[:, :, :E], (0, 2, 1))


# ----------------------------------------------------------------------------
# references
# ----------------------------------------------------------------------------
def _reference_f32(x, params, heads):
    """Pure-JAX f32 reference of nn.MultiheadAttention self-attention forward."""
    B, E, S = x.shape
    hd = E // heads
    xb = jnp.transpose(x, (0, 2, 1))  # (B, S, E)
    in_w, in_b = params["in_proj_weight"], params["in_proj_bias"]
    q = xb @ in_w[:E].T + in_b[:E]
    k = xb @ in_w[E:2 * E].T + in_b[E:2 * E]
    v = xb @ in_w[2 * E:].T + in_b[2 * E:]
    q = q.reshape(B, S, heads, hd).transpose(0, 2, 1, 3) / math.sqrt(hd)
    k = k.reshape(B, S, heads, hd).transpose(0, 2, 1, 3)
    v = v.reshape(B, S, heads, hd).transpose(0, 2, 1, 3)
    s = jnp.einsum("bhqd,bhkd->bhqk", q, k)
    p = jax.nn.softmax(s, axis=-1)
    o = jnp.einsum("bhqk,bhkd->bhqd", p, v)
    o = o.transpose(0, 2, 1, 3).reshape(B, S, E)
    o = o @ params["out_proj_weight"].T + params["out_proj_bias"]
    return jnp.transpose(o, (0, 2, 1))


def _reference_bf16_matched(x, params, heads):
    """Pure-JAX emulation of the kernel's exact math (same bf16 operand casts,
    padding, scale folding and op order).  Tight-tolerance correctness oracle."""
    B, E, S = x.shape
    w_heads, b_heads, wo_heads, bo, hd, hdp, Ep = _prep_mha_params(params, heads)
    xb = jnp.transpose(x, (0, 2, 1)).astype(jnp.float32)
    xb = jnp.pad(xb, ((0, 0), (0, 0), (0, Ep - E))).astype(jnp.bfloat16)
    x2 = xb.reshape(B * S, Ep)
    out = jnp.zeros((B, S, Ep), jnp.float32) + bo.reshape(1, 1, Ep)
    for h in range(heads):
        qkv = (jnp.dot(x2, w_heads[h], preferred_element_type=jnp.float32)
               + b_heads[h, 0]).reshape(B, S, 3 * hdp)
        q = qkv[:, :, 0 * hdp:1 * hdp].astype(jnp.bfloat16)
        k = qkv[:, :, 1 * hdp:2 * hdp].astype(jnp.bfloat16)
        v = qkv[:, :, 2 * hdp:3 * hdp].astype(jnp.bfloat16)
        s = jnp.einsum("bqd,bkd->bqk", q, k, preferred_element_type=jnp.float32)
        p = jnp.exp(s - jnp.max(s, axis=-1, keepdims=True))
        l = jnp.sum(p, axis=-1, keepdims=True)
        attn = jnp.einsum("bqk,bkd->bqd", p.astype(jnp.bfloat16), v,
                          preferred_element_type=jnp.float32) / l
        out = out + jnp.dot(attn.reshape(B * S, hdp).astype(jnp.bfloat16), wo_heads[h],
                            preferred_element_type=jnp.float32).reshape(B, S, Ep)
    return jnp.transpose(out[:, :, :E], (0, 2, 1))


def _assert_close(actual, desired, *, rtol, atol_rel):
    desired = np.asarray(desired)
    atol = atol_rel * float(np.max(np.abs(desired)))   # scale-aware absolute tolerance
    np.testing.assert_allclose(np.asarray(actual), desired, rtol=rtol, atol=atol)


# ----------------------------------------------------------------------------
# self-test
# ----------------------------------------------------------------------------
if __name__ == "__main__":

    def run_case(B, E, S, heads, key, batch_block=None):
        k_x, k_w, k_b, k_ow, k_ob = jax.random.split(key, 5)
        x = jax.random.normal(k_x, (B, E, S), dtype=jnp.float32)
        params = {
            "in_proj_weight":  0.1 * jax.random.normal(k_w, (3 * E, E), dtype=jnp.float32),
            "in_proj_bias":    0.1 * jax.random.normal(k_b, (3 * E,), dtype=jnp.float32),
            "out_proj_weight": 0.1 * jax.random.normal(k_ow, (E, E), dtype=jnp.float32),
            "out_proj_bias":   0.1 * jax.random.normal(k_ob, (E,), dtype=jnp.float32),
        }
        out = jax.block_until_ready(
            self_attention_layer_wave(x, params, heads=heads, batch_block=batch_block))
        assert out.shape == (B, E, S), out.shape

        # (1) tight parity with a pure-JAX emulation of the kernel's exact bf16 math
        ref_bf16 = jax.block_until_ready(_reference_bf16_matched(x, params, heads))
        _assert_close(out, ref_bf16, rtol=2e-3, atol_rel=2e-3)

        # (2) loose parity with the f32 torch-faithful reference (gap = bf16 MXU operands)
        ref_f32 = jax.block_until_ready(_reference_f32(x, params, heads))
        _assert_close(out, ref_f32, rtol=3e-2, atol_rel=3e-2)

    key = jax.random.PRNGKey(0)
    k1, k2, k3 = jax.random.split(key, 3)

    # small stand-in shapes (E multiple of 128: padding path is a no-op)
    run_case(B=2, E=128, S=16, heads=2, key=k1)                  # 1 fused batch step (v5e/v6e default)
    run_case(B=2, E=128, S=16, heads=2, key=k2, batch_block=1)   # 2 "parallel" batch steps (v7x-style)
    # real-model channel width (in_dim=560, heads=2): exercises E->640 / head_dim 280->384 padding
    run_case(B=2, E=560, S=16, heads=2, key=k3)

    print("KERNEL_OK")
</pallas_src>

<mosaic_0001>
module attributes {stable_mosaic.version = 11 : i64} {
  func.func @_mha_head_kernel(%arg0: i32, %arg1: i32, %arg2: memref<2x16x128xbf16, #tpu.memory_space<vmem>>, %arg3: memref<1x128x384xbf16, #tpu.memory_space<vmem>>, %arg4: memref<1x1x384xf32, #tpu.memory_space<vmem>>, %arg5: memref<1x128x128xbf16, #tpu.memory_space<vmem>>, %arg6: memref<1x128xf32, #tpu.memory_space<vmem>>, %arg7: memref<2x16x128xf32, #tpu.memory_space<vmem>>) attributes {dimension_semantics = [#tpu.dimension_semantics<parallel>, #tpu.dimension_semantics<arbitrary>], iteration_bounds = array<i64: 1, 2>, scalar_prefetch = 0 : i64, scratch_operands = 0 : i64, tpu.core_type = #tpu.core_type<tc>, window_params = [{transform_indices = @transform_0, window_bounds = array<i64: 2, 16, 128>}, {transform_indices = @transform_1, window_bounds = array<i64: 1, 128, 384>}, {transform_indices = @transform_2, window_bounds = array<i64: 1, 1, 384>}, {transform_indices = @transform_3, window_bounds = array<i64: 1, 128, 128>}, {pipeline_mode = #tpu.pipeline_mode<synchronous>, transform_indices = @transform_4, window_bounds = array<i64: 1, 128>}, {transform_indices = @transform_5, window_bounds = array<i64: 2, 16, 128>}]} {
    %c0 = arith.constant 0 : index
    %c0_0 = arith.constant 0 : index
    %c0_1 = arith.constant 0 : index
    %0 = vector.load %arg2[%c0, %c0_0, %c0_1] : memref<2x16x128xbf16, #tpu.memory_space<vmem>>, vector<2x16x128xbf16>
    %1 = vector.shape_cast %0 : vector<2x16x128xbf16> to vector<32x128xbf16>
    %c0_2 = arith.constant 0 : index
    %c0_3 = arith.constant 0 : index
    %c0_4 = arith.constant 0 : index
    %2 = vector.load %arg3[%c0_2, %c0_3, %c0_4] : memref<1x128x384xbf16, #tpu.memory_space<vmem>>, vector<1x128x384xbf16>
    %3 = vector.shape_cast %2 : vector<1x128x384xbf16> to vector<128x384xbf16>
    %cst = arith.constant dense<0.000000e+00> : vector<32x384xf32>
    %4 = tpu.matmul %1, %3, %cst {dimension_numbers = #tpu.dot_dimension_numbers<[1], [0], [0], [1], [0, 0, 1, 1], [], []>} : vector<32x128xbf16>, vector<128x384xbf16>, vector<32x384xf32> -> vector<32x384xf32>
    %c0_5 = arith.constant 0 : index
    %c0_6 = arith.constant 0 : index
    %c0_7 = arith.constant 0 : index
    %5 = vector.load %arg4[%c0_5, %c0_6, %c0_7] : memref<1x1x384xf32, #tpu.memory_space<vmem>>, vector<1x1x384xf32>
    %6 = vector.shape_cast %5 : vector<1x1x384xf32> to vector<1x384xf32>
    %7 = vector.broadcast %6 : vector<1x384xf32> to vector<32x384xf32>
    %8 = arith.addf %4, %7 : vector<32x384xf32>
    %9 = vector.shape_cast %8 : vector<32x384xf32> to vector<2x16x384xf32>
    %10 = vector.extract_strided_slice %9 {offsets = [0, 0, 0], sizes = [2, 16, 128], strides = [1, 1, 1]} : vector<2x16x384xf32> to vector<2x16x128xf32>
    %11 = arith.truncf %10 : vector<2x16x128xf32> to vector<2x16x128xbf16>
    %12 = vector.extract_strided_slice %9 {offsets = [0, 0, 128], sizes = [2, 16, 128], strides = [1, 1, 1]} : vector<2x16x384xf32> to vector<2x16x128xf32>
    %13 = arith.truncf %12 : vector<2x16x128xf32> to vector<2x16x128xbf16>
    %14 = vector.extract_strided_slice %9 {offsets = [0, 0, 256], sizes = [2, 16, 128], strides = [1, 1, 1]} : vector<2x16x384xf32> to vector<2x16x128xf32>
    %15 = arith.truncf %14 : vector<2x16x128xf32> to vector<2x16x128xbf16>
    "tpu.trace_start"() <{level = 10 : i32, message = "bqd,bkd->bqk"}> : () -> ()
    %cst_8 = arith.constant dense<0.000000e+00> : vector<2x16x16xf32>
    %16 = tpu.matmul %11, %13, %cst_8 {dimension_numbers = #tpu.dot_dimension_numbers<[2], [2], [1], [1], [0, 0, 0, 1, 1, 1], [0], [0]>} : vector<2x16x128xbf16>, vector<2x16x128xbf16>, vector<2x16x16xf32> -> vector<2x16x16xf32>
    "tpu.trace_stop"() : () -> ()
    %cst_9 = arith.constant dense<0xFF800000> : vector<2x16xf32>
    %17 = vector.multi_reduction <maximumf>, %16, %cst_9 [2] : vector<2x16x16xf32> to vector<2x16xf32>
    %18 = vector.shape_cast %17 : vector<2x16xf32> to vector<2x16x1xf32>
    %19 = vector.broadcast %18 : vector<2x16x1xf32> to vector<2x16x16xf32>
    %20 = arith.subf %16, %19 : vector<2x16x16xf32>
    %21 = math.exp %20 : vector<2x16x16xf32>
    %cst_10 = arith.constant dense<0.000000e+00> : vector<2x16xf32>
    %22 = vector.multi_reduction <add>, %21, %cst_10 [2] : vector<2x16x16xf32> to vector<2x16xf32>
    %23 = vector.shape_cast %22 : vector<2x16xf32> to vector<2x16x1xf32>
    %24 = arith.truncf %21 : vector<2x16x16xf32> to vector<2x16x16xbf16>
    "tpu.trace_start"() <{level = 10 : i32, message = "bqk,bkd->bqd"}> : () -> ()
    %cst_11 = arith.constant dense<0.000000e+00> : vector<2x16x128xf32>
    %25 = tpu.matmul %24, %15, %cst_11 {dimension_numbers = #tpu.dot_dimension_numbers<[2], [1], [1], [2], [0, 0, 0, 1, 1, 2], [0], [0]>} : vector<2x16x16xbf16>, vector<2x16x128xbf16>, vector<2x16x128xf32> -> vector<2x16x128xf32>
    "tpu.trace_stop"() : () -> ()
    %26 = tpu.reciprocal %23 : vector<2x16x1xf32> -> vector<2x16x1xf32>
    %27 = vector.broadcast %26 : vector<2x16x1xf32> to vector<2x16x128xf32>
    %28 = arith.mulf %25, %27 : vector<2x16x128xf32>
    %29 = vector.shape_cast %28 : vector<2x16x128xf32> to vector<32x128xf32>
    %30 = arith.truncf %29 : vector<32x128xf32> to vector<32x128xbf16>
    %c0_12 = arith.constant 0 : index
    %c0_13 = arith.constant 0 : index
    %c0_14 = arith.constant 0 : index
    %31 = vector.load %arg5[%c0_12, %c0_13, %c0_14] : memref<1x128x128xbf16, #tpu.memory_space<vmem>>, vector<1x128x128xbf16>
    %32 = vector.shape_cast %31 : vector<1x128x128xbf16> to vector<128x128xbf16>
    %cst_15 = arith.constant dense<0.000000e+00> : vector<32x128xf32>
    %33 = tpu.matmul %30, %32, %cst_15 {dimension_numbers = #tpu.dot_dimension_numbers<[1], [0], [0], [1], [0, 0, 1, 1], [], []>} : vector<32x128xbf16>, vector<128x128xbf16>, vector<32x128xf32> -> vector<32x128xf32>
    %34 = vector.shape_cast %33 : vector<32x128xf32> to vector<2x16x128xf32>
    %c0_i32 = arith.constant 0 : i32
    %35 = arith.cmpi eq, %arg1, %c0_i32 : i32
    %36 = arith.extui %35 : i1 to i32
    %c0_i32_16 = arith.constant 0 : i32
    %37 = arith.cmpi ne, %36, %c0_i32_16 : i32
    scf.if %37 {
      %c0_19 = arith.constant 0 : index
      %c0_20 = arith.constant 0 : index
      %41 = vector.load %arg6[%c0_19, %c0_20] : memref<1x128xf32, #tpu.memory_space<vmem>>, vector<1x128xf32>
      %42 = vector.shape_cast %41 : vector<1x128xf32> to vector<1x1x128xf32>
      %43 = vector.broadcast %42 : vector<1x1x128xf32> to vector<2x16x128xf32>
      %44 = arith.addf %34, %43 : vector<2x16x128xf32>
      %c0_21 = arith.constant 0 : index
      %c0_22 = arith.constant 0 : index
      %c0_23 = arith.constant 0 : index
      %45 = vector.load %arg7[%c0_21, %c0_22, %c0_23] : memref<2x16x128xf32, #tpu.memory_space<vmem>>, vector<2x16x128xf32>
      tpu.vector_store %arg7[%c0_21, %c0_22, %c0_23], %44 {strides = array<i32>} : memref<2x16x128xf32, #tpu.memory_space<vmem>>, vector<2x16x128xf32>,
    } else {
    }
    %c0_i32_17 = arith.constant 0 : i32
    %38 = arith.cmpi ne, %arg1, %c0_i32_17 : i32
    %39 = arith.extui %38 : i1 to i32
    %c0_i32_18 = arith.constant 0 : i32
    %40 = arith.cmpi ne, %39, %c0_i32_18 : i32
    scf.if %40 {
      %c0_19 = arith.constant 0 : index
      %c0_20 = arith.constant 0 : index
      %c0_21 = arith.constant 0 : index
      %41 = vector.load %arg7[%c0_19, %c0_20, %c0_21] : memref<2x16x128xf32, #tpu.memory_space<vmem>>, vector<2x16x128xf32>
      %42 = arith.addf %41, %34 : vector<2x16x128xf32>
      %c0_22 = arith.constant 0 : index
      %c0_23 = arith.constant 0 : index
      %c0_24 = arith.constant 0 : index
      %43 = vector.load %arg7[%c0_22, %c0_23, %c0_24] : memref<2x16x128xf32, #tpu.memory_space<vmem>>, vector<2x16x128xf32>
      tpu.vector_store %arg7[%c0_22, %c0_23, %c0_24], %42 {strides = array<i32>} : memref<2x16x128xf32, #tpu.memory_space<vmem>>, vector<2x16x128xf32>,
    } else {
    }
    return
  }
  func.func @transform_0(%arg0: i32, %arg1: i32) -> (i32, i32, i32) {
    %c0_i32 = arith.constant 0 : i32
    %c0_i32_0 = arith.constant 0 : i32
    %c0_i32_1 = arith.constant 0 : i32
    return %arg0, %c0_i32, %c0_i32_0 : i32, i32, i32
  }
  func.func @transform_1(%arg0: i32, %arg1: i32) -> (i32, i32, i32) {
    %c0_i32 = arith.constant 0 : i32
    %c0_i32_0 = arith.constant 0 : i32
    %c0_i32_1 = arith.constant 0 : i32
    return %arg1, %c0_i32, %c0_i32_0 : i32, i32, i32
  }
  func.func @transform_2(%arg0: i32, %arg1: i32) -> (i32, i32, i32) {
    %c0_i32 = arith.constant 0 : i32
    %c0_i32_0 = arith.constant 0 : i32
    %c0_i32_1 = arith.constant 0 : i32
    return %arg1, %c0_i32, %c0_i32_0 : i32, i32, i32
  }
  func.func @transform_3(%arg0: i32, %arg1: i32) -> (i32, i32, i32) {
    %c0_i32 = arith.constant 0 : i32
    %c0_i32_0 = arith.constant 0 : i32
    %c0_i32_1 = arith.constant 0 : i32
    return %arg1, %c0_i32, %c0_i32_0 : i32, i32, i32
  }
  func.func @transform_4(%arg0: i32, %arg1: i32) -> (i32, i32) {
    %c0_i32 = arith.constant 0 : i32
    %c0_i32_0 = arith.constant 0 : i32
    %c0_i32_1 = arith.constant 0 : i32
    return %c0_i32, %c0_i32_0 : i32, i32
  }
  func.func @transform_5(%arg0: i32, %arg1: i32) -> (i32, i32, i32) {
    %c0_i32 = arith.constant 0 : i32
    %c0_i32_0 = arith.constant 0 : i32
    %c0_i32_1 = arith.constant 0 : i32
    return %arg0, %c0_i32, %c0_i32_0 : i32, i32, i32
  }
}

</mosaic_0001>

<bundles_post_ra>
// kernel: tpu_custom_call.1
= control target key start
LH: loop header
LB: loop body
LE: loop exit
PB: predicated region body
PF: predicated region fallthrough
CT: control target
= control target key end

     0   :  { %s2115_s0 = inlined_call_operand.hbm [shape: bf16[2,16,128], index: 0, kind: input, shape index: {}]   ;;  %s2116_s1 = inlined_call_operand.hbm [shape: bf16[2,128,384], index: 1, kind: input, shape index: {}]   ;;  %s2117_s2 = inlined_call_operand.hbm [shape: f32[2,1,384], index: 2, kind: input, shape index: {}]   ;;  %s2118_s3 = inlined_call_operand.hbm [shape: bf16[2,128,128], index: 3, kind: input, shape index: {}]   ;;  %s2119_s4 = inlined_call_operand.hbm [shape: f32[1,128], index: 4, kind: input, shape index: {}]   ;;  %s2120_s5 = inlined_call_operand.hbm [shape: f32[2,16,128], index: 5, kind: output, shape index: {}]  }
   0x1   :  { %2135 = sst [smem:[#allocation20_spill]] %s2116_s1 }
   0x2   :  { %2136 = sst [smem:[#allocation21_spill]] %s2119_s4 }
   0x3   :  { %2137 = sst [smem:[#allocation22_spill]] %s2120_s5 }
   0x4   :  { %10 = vsyncpa [#allocation3], 0 }
   0x5   :  { %11 = vsyncpa [#allocation6], 0 }
   0x6   :  { %13 = vsyncpa [#allocation6 + $0x1], 0 }
   0x7   :  { %14 = vsyncpa [#allocation9], 0 }
   0x8   :  { %16 = vsyncpa [#allocation9 + $0x1], 0 }
   0x9   :  { %17 = vsyncpa [#allocation4], 0  ;;  %s1771_s18 = smov 0   ;;  %s1773_s19 = smov 0  }
   0xa   :  { %s1775_s20 = smov 0   ;;  %s1777_s21 = smov 0  }
   0xb   :  { %s1779_s22 = smov 0   ;;  %s1781_s23 = smov 0  }
   0xc LB: > { %2138 = sst [smem:[#allocation17_spill]] %s1712_s20  ;;  %s1800_s24 = sadd.s32 4294967295, %s1724_s23   ;;  %s1724_s23 = sphi %s1781_s23, %s23_s23   ;;  %s1720_s22 = sphi %s1779_s22, %s2168_s22   ;;  %s1716_s21 = sphi %s1777_s21, %s2167_s21   ;;  %s1712_s20 = sphi %s1775_s20, %s2163_s20   ;;  %s1708_s19 = sphi %s1773_s19, %s2166_s19   ;;  %s1704_s18 = sphi %s1771_s18, %s2165_s18  }
   0xd   : > { %s68_s25 = sadd.s32 1, %s1712_s20  ;;  %p75_p0 = scmp.ne.s32.totalorder %s1712_s20, %s1708_s19 }
   0xe   : > { %p76_p1 = scmp.eq.s32.totalorder %s1724_s23, 0  ;;  %p81_p2 = scmp.ne.s32.totalorder %s1708_s19, %s1704_s18 }
   0xf   : > { %p2121_p3 = scmp.eq.s32.totalorder %s1800_s24, 0  ;;  %p1171_p5 = scmp.ge.s32.totalorder %s1724_s23, 1 }
  0x10   : > { %p77_p4 = por %p76_p1, %p75_p0  ;;  %p191_p7 = scmp.lt.s32.totalorder %s1724_s23, 3 }
  0x11   : > { %p1811_p6 = por %p2121_p3, %p81_p2  ;;  %s1726_s28 = smov [#allocation10]  }
  0x12   : > { %p1816_p8 = pnand %p1171_p5, %p191_p7  ;;  %s221_s29 = sshll.u32 %s1726_s28, 4  ;;  %s222_s29 = int_to_ptr.vmem [resolvable:$true] %s221_s29 }
  0x13   : > { %s2139_s26 = scalar_select %p1811_p6, 1, 0 }
  0x14   : > { %s2140_s27 = scalar_select %p1816_p8, 1, 0 }
  0x15   : > { %p1344_p9 = pneg %p1816_p8  ;;  %p1363_p10 = scmp.lt.s32.totalorder %s1724_s23, 2 }
  0x16   : > { %s2128_s30 = sand.u32 1, %s1724_s23   ;;  %s2143_s4 = sld [smem:[#allocation21_spill]] }
  0x17   : > { %p1826_p11 = pnand %p1344_p9, %p2121_p3  ;;  %p1830_p12 = pnand %p1363_p10, %p77_p4 }
  0x19   : > { %s2141_s6 = scalar_select %p1826_p11, 1, 0 }
  0x1a   : > { %s2142_s7 = scalar_select %p1830_p12, 1, 0 }
  0x1b   : > { %p2125_p0 = pneg %p1826_p11 }
  0x1c   : > { %s1486_s10 = scalar_lea.hbm %s2143_s4, 16 }
  0x1d   : > { %p1487_p13 = scmp.ne.s32.totalorder %s2143_s4, %s1486_s10  ;;  %p1493_p4 = scmp.lt.u32.totalorder %s1486_s10, %s2143_s4 }
  0x1f   : > { %p1489_p1 = pnand %p2125_p0, %p1487_p13 }
  0x21   : > { %p1490_p2 = pneg %p1489_p1 }
  0x23   : > { %p1495_p5 = pnand %p1493_p4, %p1490_p2 }
  0x25   : > { %1498 = shalt.err (!%p1495_p5)
}
  0x26   : > { %s1499_s15 = scalar_lea.vmem %s222_s29, 16  ;;  %s1506_s16 = scalar_lea.vmem %s222_s29, 32 }
  0x27   : > { %p1500_p7 = scmp.ne.s32.totalorder %s222_s29, %s1499_s15  ;;  %p1507_p3 = scmp.lt.s32.totalorder %s222_s29, %s222_s29 }
  0x28   : > { %p1508_p6 = scmp.lt.s32.totalorder %s1506_s16, %s1499_s15 }
  0x29   : > { %p1502_p9 = pnand %p1500_p7, %p2125_p0 }
  0x2a   : > { %p1509_p8 = por %p1508_p6, %p1507_p3 }
  0x2b   : > { %p1503_p10 = pneg %p1502_p9 }
  0x2d   : > { %p1510_p12 = pnand %p1509_p8, %p1503_p10 }
  0x2f   : > { %1513 = shalt.err (!%p1510_p12)
}
  0x30   : > { %1350 = dma.hbm_to_vmem [thread:$0]  (!%p1826_p11), %s2143_s4, 16, %s222_s29, [#allocation9]  }
  0x31   : > { %s32_s28 = sadd.s32 1, %s1720_s22  ;;  %s1858_s8 = sand.u32 1, %s1712_s20  }
  0x32   : > { %p33_p3 = scmp.ge.s32.totalorder %s32_s28, 2  ;;  %s1320_s9 = smul.u32 192, %s1858_s8 }
  0x33   : > { %s1321_s10 = smul.u32 3072, %s1720_s22  ;;  %s2145_s1 = sld [smem:[#allocation20_spill]] }
  0x34   : > { %s2170_s28 = smov (%p33_p3, %s32_s28), 0  ;;  %s236_s14 = scalar_lea.vmem [#allocation5], %s1320_s9 }
  0x35   : > { %2144 = sst [smem:[#allocation18_spill]] %s2170_s28  ;;  %s65_s29 = ssub.s32 %s1720_s22, %s2170_s28 }
  0x36   : > { %s243_s15 = sshll.u32 %s236_s14, 4  ;;  %p66_p6 = scmp.eq.s32.totalorder %s65_s29, 0  ;;  %s1871_s15 = int_to_ptr.vmem [resolvable:$true] %s243_s15 }
  0x37   : > { %s1880_s17 = scalar_lea.sflag [#allocation6], %s2128_s30  ;;  %p2147_p12 = scmp.ne.s32.totalorder %s2142_s7, 0 }
  0x38   : > { %s1876_s16 = scalar_select %p66_p6, %s1712_s20, %s68_s25  }
  0x39   : > { %s1867_s13 = scalar_lea.hbm %s2145_s1, %s1321_s10  ;;  %p1886_p13 = pneg %p2147_p12 }
  0x3a   : > { %2146 = sst [smem:[#allocation19_spill]] %s1876_s16  ;;  %s1514_s18 = scalar_lea.hbm %s1867_s13, 3072 }
  0x3b   : > { %p1515_p8 = scmp.ne.s32.totalorder %s1867_s13, %s1514_s18  ;;  %s1519_s12 = scalar_lea.hbm %s2145_s1, 6144 }
  0x3c   : > { %s2148_s10 = scalar_select %p1886_p13, 1, 0 }
  0x3d   : > { %p1517_p1 = pnand %p1886_p13, %p1515_p8  ;;  %p1520_p4 = scmp.lt.u32.totalorder %s1867_s13, %s2145_s1 }
  0x3e   : > { %p1521_p5 = scmp.lt.u32.totalorder %s1519_s12, %s1514_s18  ;;  %p1523_p9 = scmp.lt.u32.totalorder %s1514_s18, %s1867_s13 }
  0x3f   : > { %p1518_p2 = pneg %p1517_p1 }
  0x40   : > { %p1522_p7 = por %p1521_p5, %p1520_p4 }
  0x42   : > { %p1524_p10 = por %p1523_p9, %p1522_p7 }
  0x44   : > { %p1525_p3 = pnand %p1524_p10, %p1518_p2 }
  0x46   : > { %1528 = shalt.err (!%p1525_p3)
}
  0x47   : > { %s1529_s14 = scalar_lea.vmem %s1871_s15, 3072  ;;  %s1727_s9 = smov [#allocation5]  }
  0x48   : > { %p1530_p6 = scmp.ne.s32.totalorder %s1871_s15, %s1529_s14  ;;  %s1534_s11 = sshll.u32 %s1727_s9, 4  ;;  %s1535_s11 = int_to_ptr.vmem [resolvable:$false] %s1534_s11 }
  0x49   : > { %s1536_s25 = scalar_lea.vmem %s1535_s11, 6144  ;;  %p1537_p0 = scmp.lt.s32.totalorder %s1871_s15, %s1535_s11 }
  0x4a   : > { %p1532_p8 = pnand %p1530_p6, %p1886_p13  ;;  %p1538_p11 = scmp.lt.s32.totalorder %s1536_s25, %s1529_s14 }
  0x4c   : > { %p1533_p1 = pneg %p1532_p8  ;;  %p1539_p4 = por %p1538_p11, %p1537_p0 }
  0x4e   : > { %p1540_p5 = pnand %p1539_p4, %p1533_p1 }
  0x50   : > { %1543 = shalt.err (!%p1540_p5)
}
  0x51   : > { %s1728_s18 = smov 192   ;;  %s1729_s12 = smov 12  }
  0x52   : > { %1354 = dma.hbm_to_vmem [thread:$0]  (!%p2147_p12), %s1867_s13, 3072, %s1871_s15, %s1880_s17, %s1728_s18, %s1728_s18, %s1729_s12  }
  0x53   : > { %s1730_s29 = smov [#allocation2]   ;;  %s1322_s9 = smul.u32 3, %s1858_s8 }
  0x54   : > { %s207_s30 = sshll.u32 %s1730_s29, 4  ;;  %s1544_s14 = scalar_lea.hbm %s2115_s0, 256  ;;  %s208_s30 = int_to_ptr.vmem [resolvable:$true] %s207_s30 }
  0x55   : > { %p1545_p11 = scmp.ne.s32.totalorder %s2115_s0, %s1544_s14  ;;  %p2149_p0 = scmp.ne.s32.totalorder %s2141_s6, 0 }
  0x56   : > { %p1551_p10 = scmp.lt.u32.totalorder %s1544_s14, %s2115_s0 }
  0x57   : > { %p2150_p2 = pneg %p2149_p0 }
  0x59   : > { %p1547_p7 = pnand %p1545_p11, %p2150_p2 }
  0x5b   : > { %p1548_p9 = pneg %p1547_p7 }
  0x5d   : > { %p1553_p3 = pnand %p1551_p10, %p1548_p9 }
  0x5f   : > { %1556 = shalt.err (!%p1553_p3)
}
  0x60   : > { %s1557_s13 = scalar_lea.vmem %s208_s30, 256  ;;  %p2151_p8 = pmov %p2150_p2 }
  0x61   : > { %p1558_p6 = scmp.ne.s32.totalorder %s208_s30, %s1557_s13  ;;  %p1565_p5 = scmp.lt.s32.totalorder %s208_s30, %s208_s30 }
  0x62   : > { %p1566_p12 = scmp.lt.s32.totalorder %s1557_s13, %s1557_s13 }
  0x63   : > { %p1560_p1 = pnand %p1558_p6, %p2151_p8 }
  0x64   : > { %p1567_p13 = por %p1566_p12, %p1565_p5 }
  0x65   : > { %p1561_p4 = pneg %p1560_p1 }
  0x67   : > { %p1568_p2 = pnand %p1567_p13, %p1561_p4 }
  0x69   : > { %1571 = shalt.err (!%p1568_p2)
}
  0x6a   : > { %s1731_s1 = smov 64   ;;  %s1732_s4 = smov 4  }
  0x6b   : > { %1347 = dma.hbm_to_vmem [thread:$0]  (!%p2149_p0), %s2115_s0, 256, %s208_s30, [#allocation3], %s1731_s1, %s1731_s1, %s1732_s4  }
  0x6c   : > { %s1323_s16 = smul.u32 48, %s1720_s22  ;;  %s257_s18 = scalar_lea.vmem [#allocation7], %s1322_s9 }
  0x6d   : > { %s265_s12 = sshll.u32 %s257_s18, 4  ;;  %s1177_s29 = sshll.u32 %s1858_s8, 6  ;;  %s266_s12 = int_to_ptr.vmem [resolvable:$true] %s265_s12 }
  0x6e   : > { %s263_s25 = scalar_lea.hbm %s2117_s2, %s1323_s16  ;;  %p2152_p13 = scmp.ne.s32.totalorder %s2148_s10, 0 }
  0x6f   : > { %s1572_s13 = scalar_lea.hbm %s263_s25, 48  ;;  %s1577_s5 = scalar_lea.hbm %s2117_s2, 96 }
  0x70   : > { %p1573_p12 = scmp.ne.s32.totalorder %s263_s25, %s1572_s13  ;;  %p1578_p0 = scmp.lt.u32.totalorder %s263_s25, %s2117_s2 }
  0x71   : > { %p1579_p9 = scmp.lt.u32.totalorder %s1577_s5, %s1572_s13  ;;  %p1581_p3 = scmp.lt.u32.totalorder %s1572_s13, %s263_s25 }
  0x72   : > { %p1575_p11 = pnand %p1573_p12, %p2152_p13 }
  0x73   : > { %p1580_p10 = por %p1579_p9, %p1578_p0 }
  0x74   : > { %p1576_p7 = pneg %p1575_p11 }
  0x75   : > { %p1582_p6 = por %p1581_p3, %p1580_p10 }
  0x77   : > { %p1583_p8 = pnand %p1582_p6, %p1576_p7 }
  0x79   : > { %1586 = shalt.err (!%p1583_p8)
}
  0x7a   : > { %s1587_s9 = scalar_lea.vmem %s266_s12, 48  ;;  %s1733_s15 = smov [#allocation7]  }
  0x7b   : > { %p1588_p1 = scmp.ne.s32.totalorder %s266_s12, %s1587_s9  ;;  %s1592_s16 = sshll.u32 %s1733_s15, 4  ;;  %s1593_s16 = int_to_ptr.vmem [resolvable:$false] %s1592_s16 }
  0x7c   : > { %s1594_s20 = scalar_lea.vmem %s1593_s16, 96  ;;  %p1595_p2 = scmp.lt.s32.totalorder %s266_s12, %s1593_s16 }
  0x7d   : > { %p1590_p4 = pnand %p1588_p1, %p2152_p13  ;;  %p1596_p12 = scmp.lt.s32.totalorder %s1594_s20, %s1587_s9 }
  0x7f   : > { %p1591_p5 = pneg %p1590_p4  ;;  %p1597_p11 = por %p1596_p12, %p1595_p2 }
  0x81   : > { %p1598_p0 = pnand %p1597_p11, %p1591_p5 }
  0x83   : > { %1601 = shalt.err (!%p1598_p0)
}
  0x84   : > { %p2153_p9 = scmp.ne.s32.totalorder %s2142_s7, 0  ;;  %s1227_s5 = sshll.u32 %s1720_s22, 10 }
  0x85   : > { %s1956_s14 = scalar_lea.hbm %s2118_s3, %s1227_s5  ;;  %s276_s13 = scalar_lea.vmem [#allocation8], %s1177_s29 }
  0x86   : > { %1357 = dma.hbm_to_vmem [thread:$0]  (!%p2153_p9), %s263_s25, 48, %s266_s12, %s1880_s17  }
  0x87   : > { %s283_s6 = sshll.u32 %s276_s13, 4  ;;  %s2154_s28 = sand.u32 1, %s1724_s23   ;;  %s1960_s6 = int_to_ptr.vmem [resolvable:$true] %s283_s6 }
  0x88   : > { %s1964_s30 = scalar_lea.sflag [#allocation9], %s2154_s28  ;;  %s1602_s9 = scalar_lea.hbm %s1956_s14, 1024 }
  0x89   : > { %p1603_p7 = scmp.ne.s32.totalorder %s1956_s14, %s1602_s9  ;;  %s1607_s8 = scalar_lea.hbm %s2118_s3, 2048 }
  0x8a   : > { %p1608_p6 = scmp.lt.u32.totalorder %s1956_s14, %s2118_s3  ;;  %p1609_p8 = scmp.lt.u32.totalorder %s1607_s8, %s1602_s9 }
  0x8b   : > { %p1605_p10 = pnand %p1603_p7, %p2152_p13  ;;  %p1611_p4 = scmp.lt.u32.totalorder %s1602_s9, %s1956_s14 }
  0x8c   : > { %p1610_p1 = por %p1609_p8, %p1608_p6 }
  0x8d   : > { %p1606_p3 = pneg %p1605_p10 }
  0x8e   : > { %p1612_p5 = por %p1611_p4, %p1610_p1 }
  0x90   : > { %p1613_p2 = pnand %p1612_p5, %p1606_p3 }
  0x92   : > { %1616 = shalt.err (!%p1613_p2)
}
  0x93   : > { %s1617_s29 = scalar_lea.vmem %s1960_s6, 1024  ;;  %s1734_s16 = smov [#allocation8]  }
  0x94   : > { %p1618_p12 = scmp.ne.s32.totalorder %s1960_s6, %s1617_s29  ;;  %s1622_s20 = sshll.u32 %s1734_s16, 4  ;;  %s1623_s20 = int_to_ptr.vmem [resolvable:$false] %s1622_s20 }
  0x95   : > { %s1624_s5 = scalar_lea.vmem %s1623_s20, 2048  ;;  %p1625_p7 = scmp.lt.s32.totalorder %s1960_s6, %s1623_s20 }
  0x96   : > { %p1620_p11 = pnand %p1618_p12, %p2152_p13  ;;  %p1626_p10 = scmp.lt.s32.totalorder %s1624_s5, %s1617_s29 }
  0x98   : > { %p1621_p0 = pneg %p1620_p11  ;;  %p1627_p6 = por %p1626_p10, %p1625_p7 }
  0x9a   : > { %p1628_p8 = pnand %p1627_p6, %p1621_p0 }
  0x9c   : > { %1631 = shalt.err (!%p1628_p8)
}
  0x9d   : > { %1360 = dma.hbm_to_vmem [thread:$0]  (!%p2153_p9), %s1956_s14, 1024, %s1960_s6, %s1964_s30, %s1731_s1, %s1731_s1, %s1732_s4  }
  0x9e   : > { %p2155_p13 = scmp.ne.s32.totalorder %s2140_s27, 0 }
  0x9f   : > { %p2156_p3 = scmp.eq.s32.totalorder (!%p2155_p13), %s1800_s24, 0 }
  0xa0   : > { %295 = sbr.rel (%p2155_p13) target bundleno = 1302 (0x516), region = 40 }
  0xa7   : > { %1683 = dma.done.wait (%p2156_p3), [#allocation3], 256   ;;  %p2157_p1 = pmov %p2156_p3 }
  0xa8   : > { %s301_s7 = sand.u32 1, %s1800_s24   ;;  %s303_s10 = sand.u32 1, %s1708_s19  }
  0xa9   : > { %1685 = vsyncadd (%p2157_p1), [#allocation3], 4294967040  ;;  %s1324_s18 = smul.u32 192, %s303_s10  ;;  %s302_s11 = scalar_lea.sflag [#allocation6], %s301_s7 }
  0xaa   : > { %p2158_p4 = scmp.ne.s32.totalorder %s2139_s26, 0 }
  0xab   : > { %s1999_s13 = scalar_lea.vmem [#allocation5], %s1324_s18 }
  0xac   : > { %1687 = dma.done.wait (%p2158_p4), %s302_s11, 3120  }
  0xad   : > { %1689 = vsyncadd (%p2158_p4), %s302_s11, 4294964176  ;;  %s1325_s27 = smul.u32 3, %s303_s10  ;;  %s1182_s1 = sshll.u32 %s303_s10, 6 }
  0xae   : > { %s320_s14 = scalar_lea.sflag [#allocation9], %s301_s7  ;;  %s2007_s6 = scalar_lea.vmem [#allocation8], %s1182_s1 }
  0xaf   : > { %s2005_s4 = scalar_lea.vmem [#allocation7], %s1325_s27 }
  0xb0   : > { %1691 = dma.done.wait (%p2158_p4), %s320_s14, 1024  }
  0xb1   : > { %1693 = vsyncadd (%p2158_p4), %s320_s14, 4294966272  ;;  %p2159_p9 = pmov %p2157_p1 }
  0xb2   : > { %p2160_p5 = pmov %p2157_p1 }
  0xb3   : > { %1695 = dma.done.wait (%p2159_p9), [#allocation9], 16  }
  0xb4   : > { %1697 = vsyncadd (%p2160_p5), [#allocation9], 4294967280  ;;  %v1735_v0 = vmov 0   ;;  %v1428_v1 = vld [vmem:[%s1999_s13 + $0x4] ss:$12 sps:$4 sm:$0xff]   ;;  %v1453_v18 = vld [vmem:[#allocation2 + $0x8] sm:$0xff]   ;;  %v400_v28 = vlaneseq }
  0xb5   : > { %587 = vmatprep.mubr.bf16.mxu0 %v1735_v0  ;;  %v1430_v2 = vld [vmem:[%s1999_s13] ss:$12 sps:$4 sm:$0xff]   ;;  %555 = vmatprep.subr.bf16.mxu0 %v1428_v1  ;;  %v1431_v3 = vld [vmem:[%s1999_s13 + $0x1c] ss:$12 sps:$4 sm:$0xff]   ;;  %v1433_v4 = vld [vmem:[%s1999_s13 + $0x18] ss:$12 sps:$4 sm:$0xff]  }
  0xb6   : > { %556 = vmatpush1.bf16.msra.mxu0 %v1430_v2  ;;  %v1434_v5 = vld [vmem:[%s1999_s13 + $0x34] ss:$12 sps:$4 sm:$0xff]   ;;  %v1436_v6 = vld [vmem:[%s1999_s13 + $0x30] ss:$12 sps:$4 sm:$0xff]   ;;  %v1437_v7 = vld [vmem:[%s1999_s13 + $0x4c] ss:$12 sps:$4 sm:$0xff]  }
  0xb7   : > { %557 = vmatprep.subr.bf16.mxu0 %v1431_v3  ;;  %v1439_v8 = vld [vmem:[%s1999_s13 + $0x48] ss:$12 sps:$4 sm:$0xff]   ;;  %v1440_v10 = vld [vmem:[%s1999_s13 + $0x64] ss:$12 sps:$4 sm:$0xff]   ;;  %v1442_v11 = vld [vmem:[%s1999_s13 + $0x60] ss:$12 sps:$4 sm:$0xff]  }
  0xb8   : > { %v1452_v9 = vld [vmem:[#allocation2] sm:$0xff]   ;;  %v1443_v12 = vld [vmem:[%s1999_s13 + $0x7c] ss:$12 sps:$4 sm:$0xff]   ;;  %v1445_v13 = vld [vmem:[%s1999_s13 + $0x78] ss:$12 sps:$4 sm:$0xff]   ;;  %v1736_v19 = vmov 0.0  }
  0xb9   : > { %1272 = vmatprep.mubr.bf16.mxu1 %v1452_v9  ;;  %v1446_v14 = vld [vmem:[%s1999_s13 + $0x94] ss:$12 sps:$4 sm:$0xff]   ;;  %v1448_v15 = vld [vmem:[%s1999_s13 + $0x90] ss:$12 sps:$4 sm:$0xff]   ;;  %v1449_v16 = vld [vmem:[%s1999_s13 + $0xac] ss:$12 sps:$4 sm:$0xff]  }
  0xba   : > { %558 = vmatpush1.bf16.msra.mxu0 %v1433_v4  ;;  %v1451_v17 = vld [vmem:[%s1999_s13 + $0xa8] ss:$12 sps:$4 sm:$0xff]   ;;  %vm1737_vm0 = vmmov 0   ;;  %v1455_v21 = vld [vmem:[%s1999_s13 + $0x20] ss:$12 sps:$4 sm:$0xff]   ;;  %v401_v29 = vshrl.u32 %v400_v28, 7 }
  0xbb   : > { %559 = vmatprep.subr.bf16.mxu0 %v1434_v5  ;;  %v1454_v20 = vld [vmem:[%s1999_s13 + $0x8] ss:$12 sps:$4 sm:$0xff]   ;;  %v1456_v22 = vld [vmem:[%s1999_s13 + $0x38] ss:$12 sps:$4 sm:$0xff]   ;;  %v1457_v23 = vld [vmem:[%s1999_s13 + $0x50] ss:$12 sps:$4 sm:$0xff]  }
  0xbc   : > { %1256 = vmatprep.subr.bf16.mxu1 %v1454_v20  ;;  %v1458_v24 = vld [vmem:[%s1999_s13 + $0x68] ss:$12 sps:$4 sm:$0xff]   ;;  %v1459_v25 = vld [vmem:[%s1999_s13 + $0x80] ss:$12 sps:$4 sm:$0xff]   ;;  %v1460_v26 = vld [vmem:[%s1999_s13 + $0x98] ss:$12 sps:$4 sm:$0xff]  }
  0xbd   : > { %1257 = vmatpush3.bf16.msra.mxu1 %v1454_v20  ;;  %v1461_v27 = vld [vmem:[%s1999_s13 + $0xb0] ss:$12 sps:$4 sm:$0xff]   ;;  %v402_v30 = vsub.s32 0, %v401_v29  ;;  %v398_v31 = vld [vmem:[%s2005_s4] sm:$0x7]  ;;  %v406_v32 = vsub.s32 1, %v401_v29 }
  0xbe   : > { %560 = vmatpush1.bf16.msra.mxu0 %v1436_v6  ;;  %1258 = vmatprep.subr.bf16.mxu1 %v1455_v21  ;;  %vm745_vm1 = vcmask 130048   ;;  %v410_v3 = vsub.s32 2, %v401_v29  ;;  %p1220_p2 = scmp.ne.s32.totalorder %s1716_s21, 0 }
  0xbf   : > { %561 = vmatprep.subr.bf16.mxu0 %v1437_v7  ;;  %v403_v33 = vrot.slane %v398_v31, %v402_v30  ;;  %v407_v35 = vrot.slane %v398_v31, %v406_v32 }
  0xc0   : > { %v411_v6 = vrot.slane %v398_v31, %v410_v3 }
  0xc1   : > { %1259 = vmatpush3.bf16.msra.mxu1 %v1455_v21 }
  0xc2   : > { %562 = vmatpush1.bf16.msra.mxu0 %v1439_v8  ;;  %1260 = vmatprep.subr.bf16.mxu1 %v1456_v22 }
  0xc3   : > { %563 = vmatprep.subr.bf16.mxu0 %v1440_v10 }
  0xc5   : > { %1261 = vmatpush3.bf16.msra.mxu1 %v1456_v22 }
  0xc6   : > { %564 = vmatpush1.bf16.msra.mxu0 %v1442_v11  ;;  %1262 = vmatprep.subr.bf16.mxu1 %v1457_v23 }
  0xc7   : > { %565 = vmatprep.subr.bf16.mxu0 %v1443_v12 }
  0xc9   : > { %1263 = vmatpush3.bf16.msra.mxu1 %v1457_v23 }
  0xca   : > { %566 = vmatpush1.bf16.msra.mxu0 %v1445_v13  ;;  %1264 = vmatprep.subr.bf16.mxu1 %v1458_v24 }
  0xcb   : > { %567 = vmatprep.subr.bf16.mxu0 %v1446_v14 }
  0xcd   : > { %1265 = vmatpush3.bf16.msra.mxu1 %v1458_v24 }
  0xce   : > { %568 = vmatpush1.bf16.msra.mxu0 %v1448_v15  ;;  %1266 = vmatprep.subr.bf16.mxu1 %v1459_v25 }
  0xcf   : > { %569 = vmatprep.subr.bf16.mxu0 %v1449_v16 }
  0xd1   : > { %1267 = vmatpush3.bf16.msra.mxu1 %v1459_v25 }
  0xd2   : > { %570 = vmatpush1.bf16.msra.mxu0 %v1451_v17  ;;  %1268 = vmatprep.subr.bf16.mxu1 %v1460_v26 }
  0xd3   : > { %1276 = vmatprep.subr.bf16.mxu0 %v1736_v19 }
  0xd5   : > { %588 = vmatmul.mubr.bf16.vlgmr.msra.gmra.mrb[0].mxu0 %v1452_v9  ;;  %1269 = vmatpush3.bf16.msra.mxu1 %v1460_v26 }
  0xd6   : > { %597 = vmatprep.mubr.bf16.mxu0 %v1735_v0  ;;  %1270 = vmatprep.subr.bf16.mxu1 %v1461_v27 }
  0xd9   : > { %1271 = vmatpush3.bf16.msra.mxu1 %v1461_v27 }
  0xda   : > { %1288 = vmatprep.subr.bf16.mxu1 %v1736_v19 }
  0xdc   : > { %1273 = vmatmul.mubr.bf16.vlgmr.msra.gmra.mrb[0].mxu1 %v1453_v18 }
  0xdd   : > { %598 = vmatmul.mubr.bf16.gmra.mrb[4].mxu0 %v1453_v18  ;;  %1290 = vmatprep.mubr.msk.bf16.mxu1 %vm1737_vm0, %v1736_v19 }
  0xde   : > { %1278 = vmatprep.mubr.msk.bf16.mxu0 %vm1737_vm0, %v1736_v19 }
 0x1a8   : > { %v589_v34 = vpop.f32.mrb[0].mxu0 }
 0x1a9   : > { %v591_v36 = vpop.f32.mrb[1].mxu0  ;;  %v590_v38 = vadd.f32 %v589_v34, %v403_v33 }
 0x1aa   : > { %v593_v37 = vpop.f32.mrb[2].mxu0  ;;  %v592_v41 = vadd.f32 %v591_v36, %v407_v35 }
 0x1ab   : > { %v594_v39 = vadd.f32 %v593_v37, %v403_v33  ;;  %v595_v40 = vpop.f32.mrb[3].mxu0  ;;  %v1462_v37 = vld [vmem:[%s2007_s6] sm:$0xff]  }
 0x1ac   : > { %v596_v42 = vadd.f32 %v595_v40, %v407_v35  ;;  %v1465_v40 = vld [vmem:[%s2007_s6 + $0x18] sm:$0xff]  }
 0x1ad   : > { %v657_v43 = vpack.c.bf16 %v594_v39, %v590_v38  ;;  %v1463_v38 = vld [vmem:[%s2007_s6 + $0x8] sm:$0xff]   ;;  %v1464_v39 = vld [vmem:[%s2007_s6 + $0x10] sm:$0xff]  }
 0x1ae   : > { %v659_v44 = vpack.c.bf16 %v596_v42, %v592_v41  ;;  %v1466_v41 = vld [vmem:[%s2007_s6 + $0x20] sm:$0xff]   ;;  %v1467_v42 = vld [vmem:[%s2007_s6 + $0x28] sm:$0xff]  }
 0x1af   : > { %v1274_v4 = vpop.f32.mrb[0].mxu1 }
 0x1b0   : > { %v599_v45 = vpop.f32.mrb[4].mxu0  ;;  %1277 = vmatpush3.bf16.xpose.msra.mxu0 %v659_v44  ;;  %v642_v5 = vpop.f32.mrb[1].mxu1  ;;  %v651_v9 = vadd.f32 %v1274_v4, %v411_v6  ;;  %v1469_v44 = vld [vmem:[%s2007_s6 + $0x38] sm:$0xff]  }
 0x1b1   : > { %v601_v46 = vpop.f32.mrb[5].mxu0  ;;  %1282 = vmatprep.subr.bf16.mxu0 %v1736_v19  ;;  %v600_v48 = vadd.f32 %v599_v45, %v403_v33  ;;  %v1275_v7 = vpop.f32.mrb[2].mxu1  ;;  %v643_v10 = vadd.f32 %v642_v5, %v411_v6 }
 0x1b2   : > { %v603_v47 = vpop.f32.mrb[6].mxu0  ;;  %v602_v51 = vadd.f32 %v601_v46, %v407_v35  ;;  %v645_v8 = vpop.f32.mrb[3].mxu1  ;;  %v654_v12 = vadd.f32 %v1275_v7, %v411_v6  ;;  %v1221_v7 = vld [vmem:[#allocation10] ss:$0 sm:$0xff] (!%p1220_p2) }
 0x1b3   : > { %v604_v49 = vadd.f32 %v603_v47, %v403_v33  ;;  %v605_v50 = vpop.f32.mrb[7].mxu0  ;;  %v646_v11 = vadd.f32 %v645_v8, %v411_v6 }
 0x1b4   : > { %v606_v52 = vadd.f32 %v605_v50, %v407_v35  ;;  %v662_v14 = vpack.c.bf16 %v654_v12, %v651_v9 }
 0x1b5   : > { %v658_v53 = vpack.c.bf16 %v604_v49, %v600_v48  ;;  %v661_v13 = vpack.c.bf16 %v646_v11, %v643_v10 }
 0x1b6   : > { %v660_v54 = vpack.c.bf16 %v606_v52, %v602_v51 }
 0x1b7   : > { %1279 = vmatmul.mubr.bf16.vlgmr.msra.gmra.mrb[8].mxu0 %v657_v43  ;;  %1289 = vmatpush3.bf16.msra.mxu1 %v661_v13  ;;  %v1468_v43 = vld [vmem:[%s2007_s6 + $0x30] sm:$0xff]  }
 0x1b8   : > { %1283 = vmatpush3.bf16.xpose.msra.mxu0 %v660_v54  ;;  %1284 = vmatprep.mubr.msk.bf16.mxu0 %vm1737_vm0, %v1736_v19 }
 0x1b9   : > { %1294 = vmatprep.subr.bf16.mxu0 %v1736_v19  ;;  %1300 = vmatprep.subr.bf16.mxu1 %v1462_v37 }
 0x1bf   : > { %1285 = vmatmul.mubr.bf16.vlgmr.msra.gmra.mrb[12].mxu0 %v658_v53 }
 0x1c0   : > { %1296 = vmatprep.mubr.msk.bf16.mxu0 %vm1737_vm0, %v1736_v19  ;;  %1295 = vmatpush3.bf16.msra.mxu0 %v662_v14 }
 0x28a   : > { %v697_v55 = vpop.f32.mrb[8].mxu0 }
 0x28b   : > { %v1280_v56 = vpop.f32.mrb[9].mxu0  ;;  %v746_v57 = vsel %vm745_vm1, %v697_v55, -inf }
 0x28c   : > { %747 = vmax.xlane.f32.xlu0 %v746_v57  ;;  %v700_v58 = vpop.f32.mrb[10].mxu0 }
 0x28d   : > { %v1281_v59 = vpop.f32.mrb[11].mxu0  ;;  %v749_v60 = vsel %vm745_vm1, %v700_v58, -inf }
 0x290   : > { %750 = vmax.xlane.f32.xlu0 %v749_v60 }
 0x292   : > { %v738_v61 = vpop.f32.mrb[12].mxu0 }
 0x293   : > { %v1286_v62 = vpop.f32.mrb[13].mxu0  ;;  %v752_v63 = vsel %vm745_vm1, %v738_v61, -inf }
 0x294   : > { %753 = vmax.xlane.f32.xlu1 %v752_v63  ;;  %v741_v0 = vpop.f32.mrb[14].mxu0 }
 0x295   : > { %v1287_v1 = vpop.f32.mrb[15].mxu0  ;;  %v755_v2 = vsel %vm745_vm1, %v741_v0, -inf }
 0x298   : > { %756 = vmax.xlane.f32.xlu1 %v755_v2 }
 0x319   : > { %v748_v15 = vpop.xlane.xlu0 %747 }
 0x31a   : > { %v758_v16 = vsub.f32 %v697_v55, %v748_v15 }
 0x31c   : > { %v762_v17 = vmul.f32 1.442695, %v758_v16 }
 0x31d   : > { %v751_v18 = vpop.xlane.xlu0 %750 }
 0x31e   : > { %1470 = vpow2.f32 %v762_v17  ;;  %v759_v19 = vsub.f32 %v700_v58, %v751_v18 }
 0x320   : > { %v764_v20 = vmul.f32 1.442695, %v759_v19 }
 0x321   : > { %v754_v21 = vpop.xlane.xlu1 %753 }
 0x322   : > { %1472 = vpow2.f32 %v764_v20  ;;  %v760_v22 = vsub.f32 %v738_v61, %v754_v21 }
 0x324   : > { %v766_v23 = vmul.f32 1.442695, %v760_v22 }
 0x325   : > { %v757_v24 = vpop.xlane.xlu1 %756 }
 0x326   : > { %1474 = vpow2.f32 %v766_v23  ;;  %v761_v25 = vsub.f32 %v741_v0, %v757_v24 }
 0x328   : > { %v1471_v26 = vpop.eup %1470  ;;  %v768_v27 = vmul.f32 1.442695, %v761_v25 }
 0x329   : > { %v770_v28 = vsel %vm745_vm1, %v1471_v26, 0.0 }
 0x32a   : > { %1476 = vpow2.f32 %v768_v27  ;;  %771 = vadd.xlane.f32.xlu0 %v770_v28 }
 0x32c   : > { %v1473_v29 = vpop.eup %1472 }
 0x32d   : > { %v773_v30 = vsel %vm745_vm1, %v1473_v29, 0.0  ;;  %v782_v31 = vpack.c.bf16 %v1473_v29, %v1471_v26 }
 0x32e   : > { %774 = vadd.xlane.f32.xlu1 %v773_v30 }
 0x32f   : > { %1291 = vmatmul.mubr.msk.bf16.vlgmr.msra.gmra.mrb[4].mxu1 %vm745_vm1, %v782_v31 }
 0x330   : > { %v1475_v32 = vpop.eup %1474  ;;  %1301 = vmatpush3.bf16.msra.mxu1 %v1462_v37 }
 0x331   : > { %v776_v33 = vsel %vm745_vm1, %v1475_v32, 0.0  ;;  %1302 = vmatprep.subr.bf16.mxu1 %v1463_v38 }
 0x332   : > { %777 = vadd.xlane.f32.xlu0 %v776_v33 }
 0x334   : > { %v1477_v34 = vpop.eup %1476  ;;  %1303 = vmatpush3.bf16.msra.mxu1 %v1463_v38 }
 0x335   : > { %v779_v35 = vsel %vm745_vm1, %v1477_v34, 0.0  ;;  %v783_v36 = vpack.c.bf16 %v1477_v34, %v1475_v32  ;;  %1304 = vmatprep.subr.bf16.mxu1 %v1464_v39 }
 0x336   : > { %780 = vadd.xlane.f32.xlu1 %v779_v35 }
 0x337   : > { %1297 = vmatmul.mubr.msk.bf16.vlgmr.msra.gmra.mrb[16].mxu0 %vm745_vm1, %v783_v36 }
 0x338   : > { %1305 = vmatpush3.bf16.msra.mxu1 %v1464_v39 }
 0x339   : > { %1306 = vmatprep.subr.bf16.mxu1 %v1465_v40 }
 0x33c   : > { %1307 = vmatpush3.bf16.msra.mxu1 %v1465_v40 }
 0x33d   : > { %1308 = vmatprep.subr.bf16.mxu1 %v1466_v41 }
 0x340   : > { %1309 = vmatpush3.bf16.msra.mxu1 %v1466_v41 }
 0x341   : > { %1310 = vmatprep.subr.bf16.mxu1 %v1467_v42 }
 0x344   : > { %1311 = vmatpush3.bf16.msra.mxu1 %v1467_v42 }
 0x345   : > { %1312 = vmatprep.subr.bf16.mxu1 %v1468_v43 }
 0x348   : > { %1313 = vmatpush3.bf16.msra.mxu1 %v1468_v43 }
 0x349   : > { %1314 = vmatprep.subr.bf16.mxu1 %v1469_v44 }
 0x34c   : > { %1315 = vmatpush3.bf16.msra.mxu1 %v1469_v44 }
 0x3b7   : > { %v772_v45 = vpop.xlane.xlu0 %771 }
 0x3b8   : > { %1478 = vrcp.f32 %v772_v45 }
 0x3bb   : > { %v775_v46 = vpop.xlane.xlu1 %774 }
 0x3bc   : > { %1480 = vrcp.f32 %v775_v46 }
 0x3bf   : > { %v778_v47 = vpop.xlane.xlu0 %777 }
 0x3c0   : > { %1482 = vrcp.f32 %v778_v47 }
 0x3c2   : > { %v1479_v50 = vpop.eup %1478 }
 0x3c3   : > { %v781_v48 = vpop.xlane.xlu1 %780 }
 0x3c4   : > { %1484 = vrcp.f32 %v781_v48 }
 0x3c6   : > { %v1481_v52 = vpop.eup %1480 }
 0x3ca   : > { %v1483_v59 = vpop.eup %1482 }
 0x3ce   : > { %v1485_v61 = vpop.eup %1484 }
 0x402   : > { %v821_v49 = vpop.f32.mrb[4].mxu1 }
 0x403   : > { %v1292_v51 = vpop.f32.mrb[5].mxu1  ;;  %v876_v54 = vmul.f32 %v1479_v50, %v821_v49 }
 0x404   : > { %v824_v53 = vpop.f32.mrb[6].mxu1 }
 0x405   : > { %v877_v55 = vmul.f32 %v1481_v52, %v824_v53  ;;  %v1293_v56 = vpop.f32.mrb[7].mxu1 }
 0x407   : > { %v880_v57 = vpack.c.bf16 %v877_v55, %v876_v54 }
 0x409   : > { %1316 = vmatprep.mubr.bf16.mxu1 %v880_v57 }
 0x40a   : > { %v865_v58 = vpop.f32.mrb[16].mxu0 }
 0x40b   : > { %v1298_v60 = vpop.f32.mrb[17].mxu0  ;;  %v878_v63 = vmul.f32 %v1483_v59, %v865_v58 }
 0x40c   : > { %v868_v62 = vpop.f32.mrb[18].mxu0 }
 0x40d   : > { %v879_v0 = vmul.f32 %v1485_v61, %v868_v62  ;;  %v1299_v1 = vpop.f32.mrb[19].mxu0 }
 0x40f   : > { %v881_v2 = vpack.c.bf16 %v879_v0, %v878_v63 }
 0x411   : > { %1317 = vmatmul.mubr.bf16.vlgmr.msra.gmra.mrb[8].mxu1 %v881_v2 }
 0x4e1   : > { %998 = sbr.rel (%p1220_p2) target bundleno = 1259 (0x4eb), region = 64 }
 0x4e4   : > { %v1318_v3 = vpop.f32.mrb[8].mxu1 }
 0x4e5   : > { %v980_v4 = vpop.f32.mrb[9].mxu1  ;;  %v1008_v10 = vadd.f32 (!%p1220_p2), %v1318_v3, %v1221_v7 }
 0x4e6   : > { %v1319_v5 = vpop.f32.mrb[10].mxu1  ;;  %v1006_v8 = vadd.f32 (!%p1220_p2), %v1221_v7, %v980_v4 }
 0x4e7   : > { %v983_v6 = vpop.f32.mrb[11].mxu1  ;;  %v1009_v11 = vadd.f32 (!%p1220_p2), %v1319_v5, %v1221_v7  ;;  %1012 = vst [vmem:[#allocation11 + $0x10] sm:$0xff] (!%p1220_p2), %v1008_v10 }
 0x4e8   : > { %v1007_v9 = vadd.f32 %v1221_v7, %v983_v6  ;;  %1010 = vst [vmem:[#allocation11] sm:$0xff] %v1006_v8 }
 0x4e9   : > { %1013 = vst [vmem:[#allocation11 + $0x18] sm:$0xff] %v1009_v11 }
 0x4ea   : > { %1011 = vst [vmem:[#allocation11 + $0x8] sm:$0xff] %v1007_v9 }
 0x4eb PF: > { %p1222_p12 = scmp.eq.s32.totalorder %s1716_s21, 0 }
 0x4ed   : > { %1017 = sbr.rel (%p1222_p12) target bundleno = 1270 (0x4f6), region = 68 }
 0x4f0   : > { %v1021_v18 = vld [vmem:[#allocation11 + $0x18] sm:$0xff] (!%p1222_p12) }
 0x4f1   : > { %v1019_v13 = vld [vmem:[#allocation11 + $0x8] sm:$0xff] (!%p1222_p12)  ;;  %v1020_v14 = vld [vmem:[#allocation11 + $0x10] sm:$0xff] (!%p1222_p12)  ;;  %v1025_v19 = vadd.f32 (!%p1222_p12), %v1319_v5, %v1021_v18 }
 0x4f2   : > { %v1018_v12 = vld [vmem:[#allocation11] sm:$0xff] (!%p1222_p12)  ;;  %v1023_v16 = vadd.f32 (!%p1222_p12), %v1019_v13, %v983_v6  ;;  %v1024_v17 = vadd.f32 (!%p1222_p12), %v1318_v3, %v1020_v14 }
 0x4f3   : > { %v1022_v15 = vadd.f32 (!%p1222_p12), %v1018_v12, %v980_v4  ;;  %1029 = vst [vmem:[#allocation11 + $0x18] sm:$0xff] (!%p1222_p12), %v1025_v19 }
 0x4f4   : > { %1027 = vst [vmem:[#allocation11 + $0x8] sm:$0xff] %v1023_v16  ;;  %1028 = vst [vmem:[#allocation11 + $0x10] sm:$0xff] %v1024_v17 }
 0x4f5   : > { %1026 = vst [vmem:[#allocation11] sm:$0xff] %v1022_v15 }
 0x4f6 PF: > { %p1366_p11 = scmp.eq.s32.totalorder %s1800_s24, 1  ;;  %s1738_s26 = smov [#allocation11]  }
 0x4f7   : > { %s1040_s28 = sshll.u32 %s1738_s26, 4  ;;  %s1041_s28 = int_to_ptr.vmem [resolvable:$true] %s1040_s28 }
 0x4f8   : > { %s1632_s21 = scalar_lea.vmem %s1041_s28, 512  ;;  %p1639_p6 = scmp.lt.s32.totalorder %s1041_s28, %s1041_s28 }
 0x4f9   : > { %p1633_p0 = scmp.ne.s32.totalorder %s1041_s28, %s1632_s21  ;;  %p1640_p8 = scmp.lt.s32.totalorder %s1632_s21, %s1632_s21 }
 0x4fb   : > { %p1634_p7 = pnand %p1633_p0, %p1366_p11  ;;  %p1641_p13 = por %p1640_p8, %p1639_p6 }
 0x4fd   : > { %p1635_p10 = pneg %p1634_p7 }
 0x4ff   : > { %p1642_p3 = pnand %p1641_p13, %p1635_p10 }
 0x501   : > { %1645 = shalt.err (!%p1642_p3)
}
 0x502   : > { %s2161_s17 = sld [smem:[#allocation22_spill]] }
 0x508   : > { %s1646_s12 = scalar_lea.hbm %s2161_s17, 512 }
 0x509   : > { %p1647_p1 = scmp.ne.s32.totalorder %s2161_s17, %s1646_s12  ;;  %p1652_p5 = scmp.lt.u32.totalorder %s1646_s12, %s2161_s17 }
 0x50b   : > { %p1648_p4 = pnand %p1647_p1, %p1366_p11 }
 0x50d   : > { %p1649_p9 = pneg %p1648_p4 }
 0x50f   : > { %p1654_p2 = pnand %p1652_p5, %p1649_p9 }
 0x511   : > { %1657 = shalt.err (!%p1654_p2)
}
 0x512   : > { %s1739_s16 = smov 128   ;;  %s1740_s20 = smov 8  }
 0x513   : > { %1341 = dma.vmem_to_hbm [thread:$0]  (%p1366_p11), %s1041_s28, 512, %s2161_s17, [#allocation4], %s1739_s16, %s1739_s16, %s1740_s20  }
 0x514   : > { %1699 = dma.done.wait (%p1366_p11), [#allocation4], 512  }
 0x515   : > { %1701 = vsyncadd (%p1366_p11), [#allocation4], 4294966784 }
 0x516 PF: > { %s23_s23 = sadd.s32 1, %s1724_s23   ;;  %s2162_s10 = sld [smem:[#allocation17_spill]] }
 0x517   : > { %p20_p12 = scmp.ge.s32.totalorder %s23_s23, 4   ;;  %s2163_s20 = sld [smem:[#allocation19_spill]] }
 0x518   : > { %s2164_s11 = sld [smem:[#allocation18_spill]]  ;;  %s2165_s18 = smov %s1708_s19 }
 0x519   : > { %s2167_s21 = smov %s1720_s22  ;;  %22 = sbr.rel (!%p20_p12) target bundleno = 12 (0xc), region = 120 }
 0x51c   : > { %s2166_s19 = smov %s2162_s10 }
 0x51e   : > { %s2168_s22 = smov %s2164_s11 }
 0x520   :  { %1056 = vsyncpa [#allocation3], 1 }
 0x521   :  { %1058 = vsyncpa [#allocation3 + $0x1], 1 }
 0x522   :  { %1059 = vsyncpa [#allocation6], 1 }
 0x523   :  { %1061 = vsyncpa [#allocation6 + $0x1], 1 }
 0x524   :  { %1062 = vsyncpa [#allocation9], 1 }
 0x525   :  { %1064 = vsyncpa [#allocation9 + $0x1], 1 }
 0x526   :  { %1065 = vsyncpa [#allocation4], 1 }
 0x527   :  { %1067 = vsyncpa [#allocation4 + $0x1], 1 }

</bundles_post_ra>
